<compile_context>
chip_gen: v7x
topology: tpu7x:2x2x1
jax: 0.10.0
libtpu: 0.0.40
codegen_flags: <defaults>
</compile_context>

<pallas_src>
import jax
import jax.numpy as jnp
from jax.experimental import pallas as pl
from jax.experimental.pallas import tpu as pltpu


def convgru_update_kernel(msg_ref, x_ref, wm_ref, b_ref, wgx_ref, wcx_ref, h_ref):
    # Blocks are (C, TP): channels on sublanes, pixels on lanes.
    c = x_ref.shape[0]
    msg = msg_ref[...]
    x = x_ref[...]

    # Single fused matmul for everything that multiplies `msg`:
    #   rows [0, 2C)  : gate pre-activations' msg contribution  (+ gate biases)
    #   rows [2C, 3C) : candidate pre-activation's msg contribution (+ cand bias)
    m_all = (jnp.dot(wm_ref[...], msg, preferred_element_type=jnp.float32)
             + b_ref[...])

    # Reset/update gates: add the x-side contribution, one fused sigmoid.
    gates = jax.nn.sigmoid(
        m_all[:2 * c, :]
        + jnp.dot(wgx_ref[...], x, preferred_element_type=jnp.float32))
    r = gates[:c, :]     # reset gate  (matches gates[:, :C] in NCHW)
    u = gates[c:, :]     # update gate (matches gates[:, C:])

    # Candidate: tanh(msg part + Wc_x @ (r * x)); bias already folded into m_all.
    cand = jnp.tanh(
        m_all[2 * c:, :]
        + jnp.dot(wcx_ref[...], r * x, preferred_element_type=jnp.float32))

    # h = (1 - u) * x + u * cand  ==  x + u * (cand - x)
    h_ref[...] = (x + u * (cand - x)).astype(h_ref.dtype)


def make_params(key, hidden_dim):
    """Deterministically initialize ConvGRUCell params (1x1 convs, bias=True)."""
    c = hidden_dim
    k = jax.random.split(key, 4)
    # PyTorch Conv2d weight layout: (out_ch, in_ch, 1, 1); bias: (out_ch,)
    w_gates = jax.random.normal(k[0], (2 * c, 2 * c, 1, 1), jnp.float32) * 0.1
    b_gates = jax.random.normal(k[1], (2 * c,), jnp.float32) * 0.1
    w_can = jax.random.normal(k[2], (c, 2 * c, 1, 1), jnp.float32) * 0.1
    b_can = jax.random.normal(k[3], (c,), jnp.float32) * 0.1
    return w_gates, b_gates, w_can, b_can


def split_params_for_kernel(w_gates, b_gates, w_can, b_can, hidden_dim):
    """Convert Conv2d (out,in,1,1) weights into W@X operands for the (C, TP) layout.

    Input-channel order in the PyTorch ConvGRUCell is [message | x]; gate output
    order is [reset | update].  The msg-side columns of both convs are stacked into
    one (3C, C) operand so the kernel needs a single dot against `msg`.
    """
    c = hidden_dim
    wg = w_gates[:, :, 0, 0]                                  # (2C, 2C), cols [msg | x]
    wc = w_can[:, :, 0, 0]                                    # (C,  2C)
    wm = jnp.concatenate([wg[:, :c], wc[:, :c]], axis=0)      # (3C, C): [reset|update|cand]
    b_all = jnp.concatenate([b_gates, b_can]).reshape(3 * c, 1)
    wg_x = wg[:, c:]                                          # (2C, C)
    wc_x = wc[:, c:]                                          # (C,  C)
    return (wm, b_all, wg_x, wc_x)


def conv_update(x_nchw, msg_nchw, kernel_params, *, tp=16384):
    """Pallas implementation of conv_Update.forward(x, message) -> h_next (NCHW)."""
    n, c, h, w = x_nchw.shape
    hw = h * w

    # Pixel tile on the lane axis: a multiple of 128, or the full pixel extent
    # (a full-extent block is always legal, and needed when hw % 128 != 0 or hw < tp).
    tp = max(128, (tp // 128) * 128)
    if tp >= hw or hw % 128 != 0:
        tp = hw

    # Free reshapes only — no jnp.pad, no output slice.
    x3 = x_nchw.reshape(n, c, hw)
    m3 = msg_nchw.reshape(n, c, hw)

    grid = (n, pl.cdiv(hw, tp))

    # Data: one batch element, all channels (sublanes), TP pixels (lanes) per step.
    data_spec = pl.BlockSpec((None, c, tp), lambda i, j: (i, 0, j))
    # Weights / biases: full arrays, constant index_map -> stay VMEM-resident.
    wm_spec = pl.BlockSpec((3 * c, c), lambda i, j: (0, 0))
    b_spec = pl.BlockSpec((3 * c, 1), lambda i, j: (0, 0))
    wgx_spec = pl.BlockSpec((2 * c, c), lambda i, j: (0, 0))
    wcx_spec = pl.BlockSpec((c, c), lambda i, j: (0, 0))

    # Explicit scoped-VMEM budget: double-buffered data blocks (2 in + 1 out) plus
    # ~12 live (<=3C, tp) f32 intermediates plus tiny weights.  Keep >= 32 MiB
    # (v5e default is only 16 MiB) and cap at 48 MiB (v7x has 64 MiB physical).
    vmem_need = (6 + 14) * c * tp * 4 + 8 * c * c * 4
    vmem_limit = int(min(max(vmem_need, 32 << 20), 48 << 20))

    out3 = pl.pallas_call(
        convgru_update_kernel,
        out_shape=jax.ShapeDtypeStruct((n, c, hw), x_nchw.dtype),
        grid=grid,
        in_specs=[data_spec, data_spec, wm_spec, b_spec, wgx_spec, wcx_spec],
        out_specs=data_spec,
        compiler_params=pltpu.CompilerParams(
            dimension_semantics=("parallel", "parallel"),
            vmem_limit_bytes=vmem_limit),
    )(m3, x3, *kernel_params)

    return out3.reshape(n, c, h, w)


def conv_update_reference(x_nchw, msg_nchw, w_gates, b_gates, w_can, b_can, hidden_dim):
    """Plain-JAX reference following the PyTorch ConvGRUCell exactly (1x1 convs)."""
    c = hidden_dim
    combined = jnp.concatenate([msg_nchw, x_nchw], axis=1)                 # (N,2C,H,W)
    gates = jnp.einsum('oi,nihw->nohw', w_gates[:, :, 0, 0], combined) \
        + b_gates[None, :, None, None]
    reset = jax.nn.sigmoid(gates[:, :c])
    update = jax.nn.sigmoid(gates[:, c:])
    combined2 = jnp.concatenate([msg_nchw, reset * x_nchw], axis=1)
    cand = jnp.tanh(jnp.einsum('oi,nihw->nohw', w_can[:, :, 0, 0], combined2)
                    + b_can[None, :, None, None])
    return (1.0 - update) * x_nchw + update * cand


if __name__ == "__main__":
    hidden_dim = 10                     # module default
    N, H, W = 2, 16, 16                 # H*W = 256 pixels on the lane axis

    key = jax.random.PRNGKey(0)
    k_x, k_m, k_p = jax.random.split(key, 3)
    x = jax.random.normal(k_x, (N, hidden_dim, H, W), jnp.float32)        # hidden state
    message = jax.random.normal(k_m, (N, hidden_dim, H, W), jnp.float32)  # GRU input

    w_gates, b_gates, w_can, b_can = make_params(k_p, hidden_dim)
    kernel_params = split_params_for_kernel(w_gates, b_gates, w_can, b_can, hidden_dim)

    out = conv_update(x, message, kernel_params)
    out = jax.block_until_ready(out)

    ref = conv_update_reference(x, message, w_gates, b_gates, w_can, b_can, hidden_dim)
    assert out.shape == (N, hidden_dim, H, W)
    assert jnp.allclose(out, ref, atol=1e-5, rtol=1e-5), "mismatch vs reference"

    print("KERNEL_OK")
</pallas_src>

<mosaic_0001>
module attributes {stable_mosaic.version = 11 : i64} {
  func.func @convgru_update_kernel(%arg0: i32, %arg1: i32, %arg2: memref<1x10x256xf32, #tpu.memory_space<vmem>>, %arg3: memref<1x10x256xf32, #tpu.memory_space<vmem>>, %arg4: memref<30x10xf32, #tpu.memory_space<vmem>>, %arg5: memref<30x1xf32, #tpu.memory_space<vmem>>, %arg6: memref<20x10xf32, #tpu.memory_space<vmem>>, %arg7: memref<10x10xf32, #tpu.memory_space<vmem>>, %arg8: memref<1x10x256xf32, #tpu.memory_space<vmem>>) attributes {dimension_semantics = [#tpu.dimension_semantics<parallel>, #tpu.dimension_semantics<parallel>], iteration_bounds = array<i64: 2, 1>, scalar_prefetch = 0 : i64, scratch_operands = 0 : i64, tpu.core_type = #tpu.core_type<tc>, window_params = [{transform_indices = @transform_0, window_bounds = array<i64: 1, 10, 256>}, {transform_indices = @transform_1, window_bounds = array<i64: 1, 10, 256>}, {pipeline_mode = #tpu.pipeline_mode<synchronous>, transform_indices = @transform_2, window_bounds = array<i64: 30, 10>}, {pipeline_mode = #tpu.pipeline_mode<synchronous>, transform_indices = @transform_3, window_bounds = array<i64: 30, 1>}, {pipeline_mode = #tpu.pipeline_mode<synchronous>, transform_indices = @transform_4, window_bounds = array<i64: 20, 10>}, {pipeline_mode = #tpu.pipeline_mode<synchronous>, transform_indices = @transform_5, window_bounds = array<i64: 10, 10>}, {transform_indices = @transform_6, window_bounds = array<i64: 1, 10, 256>}]} {
    %c0 = arith.constant 0 : index
    %c0_0 = arith.constant 0 : index
    %c0_1 = arith.constant 0 : index
    %0 = vector.load %arg2[%c0, %c0_0, %c0_1] : memref<1x10x256xf32, #tpu.memory_space<vmem>>, vector<1x10x256xf32>
    %1 = vector.shape_cast %0 : vector<1x10x256xf32> to vector<10x256xf32>
    %c0_2 = arith.constant 0 : index
    %c0_3 = arith.constant 0 : index
    %c0_4 = arith.constant 0 : index
    %2 = vector.load %arg3[%c0_2, %c0_3, %c0_4] : memref<1x10x256xf32, #tpu.memory_space<vmem>>, vector<1x10x256xf32>
    %3 = vector.shape_cast %2 : vector<1x10x256xf32> to vector<10x256xf32>
    %c0_5 = arith.constant 0 : index
    %c0_6 = arith.constant 0 : index
    %4 = vector.load %arg4[%c0_5, %c0_6] : memref<30x10xf32, #tpu.memory_space<vmem>>, vector<30x10xf32>
    %cst = arith.constant dense<0.000000e+00> : vector<30x256xf32>
    %5 = tpu.matmul %4, %1, %cst {dimension_numbers = #tpu.dot_dimension_numbers<[1], [0], [0], [1], [0, 0, 1, 1], [], []>} : vector<30x10xf32>, vector<10x256xf32>, vector<30x256xf32> -> vector<30x256xf32>
    %c0_7 = arith.constant 0 : index
    %c0_8 = arith.constant 0 : index
    %6 = vector.load %arg5[%c0_7, %c0_8] : memref<30x1xf32, #tpu.memory_space<vmem>>, vector<30x1xf32>
    %7 = vector.broadcast %6 : vector<30x1xf32> to vector<30x256xf32>
    %8 = arith.addf %5, %7 : vector<30x256xf32>
    %9 = vector.extract_strided_slice %8 {offsets = [0, 0], sizes = [20, 256], strides = [1, 1]} : vector<30x256xf32> to vector<20x256xf32>
    %c0_9 = arith.constant 0 : index
    %c0_10 = arith.constant 0 : index
    %10 = vector.load %arg6[%c0_9, %c0_10] : memref<20x10xf32, #tpu.memory_space<vmem>>, vector<20x10xf32>
    %cst_11 = arith.constant dense<0.000000e+00> : vector<20x256xf32>
    %11 = tpu.matmul %10, %3, %cst_11 {dimension_numbers = #tpu.dot_dimension_numbers<[1], [0], [0], [1], [0, 0, 1, 1], [], []>} : vector<20x10xf32>, vector<10x256xf32>, vector<20x256xf32> -> vector<20x256xf32>
    %12 = arith.addf %9, %11 : vector<20x256xf32>
    %13 = arith.negf %12 : vector<20x256xf32>
    %14 = math.exp %13 : vector<20x256xf32>
    %cst_12 = arith.constant 1.000000e+00 : f32
    %15 = vector.broadcast %cst_12 : f32 to vector<20x256xf32>
    %16 = arith.addf %15, %14 : vector<20x256xf32>
    %17 = arith.divf %15, %16 : vector<20x256xf32>
    %18 = vector.extract_strided_slice %17 {offsets = [0, 0], sizes = [10, 256], strides = [1, 1]} : vector<20x256xf32> to vector<10x256xf32>
    %19 = vector.extract_strided_slice %17 {offsets = [10, 0], sizes = [10, 256], strides = [1, 1]} : vector<20x256xf32> to vector<10x256xf32>
    %20 = vector.extract_strided_slice %8 {offsets = [20, 0], sizes = [10, 256], strides = [1, 1]} : vector<30x256xf32> to vector<10x256xf32>
    %c0_13 = arith.constant 0 : index
    %c0_14 = arith.constant 0 : index
    %21 = vector.load %arg7[%c0_13, %c0_14] : memref<10x10xf32, #tpu.memory_space<vmem>>, vector<10x10xf32>
    %22 = arith.mulf %18, %3 : vector<10x256xf32>
    %cst_15 = arith.constant dense<0.000000e+00> : vector<10x256xf32>
    %23 = tpu.matmul %21, %22, %cst_15 {dimension_numbers = #tpu.dot_dimension_numbers<[1], [0], [0], [1], [0, 0, 1, 1], [], []>} : vector<10x10xf32>, vector<10x256xf32>, vector<10x256xf32> -> vector<10x256xf32>
    %24 = arith.addf %20, %23 : vector<10x256xf32>
    %25 = math.tanh %24 : vector<10x256xf32>
    %26 = arith.subf %25, %3 : vector<10x256xf32>
    %27 = arith.mulf %19, %26 : vector<10x256xf32>
    %28 = arith.addf %3, %27 : vector<10x256xf32>
    %c0_16 = arith.constant 0 : index
    %c0_17 = arith.constant 0 : index
    %c0_18 = arith.constant 0 : index
    %29 = vector.load %arg8[%c0_16, %c0_17, %c0_18] : memref<1x10x256xf32, #tpu.memory_space<vmem>>, vector<1x10x256xf32>
    %30 = vector.shape_cast %29 : vector<1x10x256xf32> to vector<10x256xf32>
    %31 = vector.shape_cast %28 : vector<10x256xf32> to vector<1x10x256xf32>
    tpu.vector_store %arg8[%c0_16, %c0_17, %c0_18], %31 {strides = array<i32>} : memref<1x10x256xf32, #tpu.memory_space<vmem>>, vector<1x10x256xf32>,
    return
  }
  func.func @transform_0(%arg0: i32, %arg1: i32) -> (i32, i32, i32) {
    %c0_i32 = arith.constant 0 : i32
    %c0_i32_0 = arith.constant 0 : i32
    return %arg0, %c0_i32, %arg1 : i32, i32, i32
  }
  func.func @transform_1(%arg0: i32, %arg1: i32) -> (i32, i32, i32) {
    %c0_i32 = arith.constant 0 : i32
    %c0_i32_0 = arith.constant 0 : i32
    return %arg0, %c0_i32, %arg1 : i32, i32, i32
  }
  func.func @transform_2(%arg0: i32, %arg1: i32) -> (i32, i32) {
    %c0_i32 = arith.constant 0 : i32
    %c0_i32_0 = arith.constant 0 : i32
    %c0_i32_1 = arith.constant 0 : i32
    return %c0_i32, %c0_i32_0 : i32, i32
  }
  func.func @transform_3(%arg0: i32, %arg1: i32) -> (i32, i32) {
    %c0_i32 = arith.constant 0 : i32
    %c0_i32_0 = arith.constant 0 : i32
    %c0_i32_1 = arith.constant 0 : i32
    return %c0_i32, %c0_i32_0 : i32, i32
  }
  func.func @transform_4(%arg0: i32, %arg1: i32) -> (i32, i32) {
    %c0_i32 = arith.constant 0 : i32
    %c0_i32_0 = arith.constant 0 : i32
    %c0_i32_1 = arith.constant 0 : i32
    return %c0_i32, %c0_i32_0 : i32, i32
  }
  func.func @transform_5(%arg0: i32, %arg1: i32) -> (i32, i32) {
    %c0_i32 = arith.constant 0 : i32
    %c0_i32_0 = arith.constant 0 : i32
    %c0_i32_1 = arith.constant 0 : i32
    return %c0_i32, %c0_i32_0 : i32, i32
  }
  func.func @transform_6(%arg0: i32, %arg1: i32) -> (i32, i32, i32) {
    %c0_i32 = arith.constant 0 : i32
    %c0_i32_0 = arith.constant 0 : i32
    return %arg0, %c0_i32, %arg1 : i32, i32, i32
  }
}

</mosaic_0001>

<bundles_post_ra>
// kernel: tpu_custom_call.1
= control target key start
LH: loop header
LB: loop body
LE: loop exit
PB: predicated region body
PF: predicated region fallthrough
CT: control target
= control target key end

     0   :  { %s1083_s21 = smov 0   ;;  %s1085_s22 = smov 0   ;;  %s1241_s0 = inlined_call_operand.vmem [shape: f32[2,10,256], index: 0, kind: input, shape index: {}]   ;;  %s1242_s1 = inlined_call_operand.vmem [shape: f32[2,10,256], index: 1, kind: input, shape index: {}]   ;;  %s1243_s2 = inlined_call_operand.vmem [shape: f32[30,10], index: 2, kind: input, shape index: {}]   ;;  %s1244_s3 = inlined_call_operand.vmem [shape: f32[30,1], index: 3, kind: input, shape index: {}]   ;;  %s1245_s4 = inlined_call_operand.vmem [shape: f32[20,10], index: 4, kind: input, shape index: {}]   ;;  %s1246_s5 = inlined_call_operand.vmem [shape: f32[10,10], index: 5, kind: input, shape index: {}]   ;;  %s1247_s6 = inlined_call_operand.vmem [shape: f32[2,10,256], index: 6, kind: output, shape index: {}]  }
   0x1   :  { %s1087_s23 = smov 0  }
   0x2 LB: > { %s28_s24 = sadd.s32 1, %s1039_s22  ;;  %p899_p0 = scmp.ge.s32.totalorder %s1043_s23, 1  ;;  %s1043_s23 = sphi %s1087_s23, %s16_s23   ;;  %s1039_s22 = sphi %s1085_s22, %s1251_s22   ;;  %s1035_s21 = sphi %s1083_s21, %s1250_s21  }
   0x3   : > { %p30_p1 = scmp.ge.s32.totalorder %s28_s24, 2  ;;  %p250_p2 = scmp.lt.s32.totalorder %s1043_s23, 3 }
   0x5   : > { %s1253_s24 = smov (%p30_p1, %s28_s24), 0  ;;  %p251_p3 = pnand %p899_p0, %p250_p2 }
   0x6   : > { %p298_p4 = scmp.lt.s32.totalorder (!%p251_p3), %s1035_s21, 1  ;;  %v1045_v0 = vmov (!%p251_p3), 0.0   ;;  %vm376_vm0 = vcmask (!%p251_p3), 1041408   ;;  %v1046_v1 = vmov (!%p251_p3), 0   ;;  %v340_v2 = vld [vmem:[%s1244_s3 + $0x8] sm:$0xff] (!%p251_p3)  ;;  %v339_v3 = vld [vmem:[%s1244_s3] sm:$0xff] (!%p251_p3) }
   0x7   : > { %254 = sbr.rel (%p251_p3) target bundleno = 532 (0x214), region = 44  ;;  %447 = vmatprep.mubr.f32.mxu0 (!%p251_p3), %v1045_v0  ;;  %453 = vmatprep.mubr.f32.mxu1 (!%p251_p3), %v1045_v0  ;;  %vm1047_vm1 = vmmov (!%p251_p3), 1   ;;  %v335_v16 = vld [vmem:[%s1243_s2] sm:$0xff] (!%p251_p3)  ;;  %vm363_vm3 = vcmask (!%p251_p3), 80896   ;;  %v336_v18 = vld [vmem:[%s1243_s2 + $0x8] sm:$0xff] (!%p251_p3)  ;;  %v337_v21 = vld [vmem:[%s1243_s2 + $0x10] sm:$0xff] (!%p251_p3) }
   0x8   : > { %987 = vset.pattern.permute.xlu0 (!%p251_p3), %v1046_v1  ;;  %988 = vset.pattern.permute.xlu1 (!%p251_p3), %v1046_v1  ;;  %vm1119_vm2 = vmpackc.low (!%p251_p3), %vm376_vm0, %vm1047_vm1  ;;  %v472_v19 = vld [vmem:[%s1245_s4] sm:$0xff] (!%p251_p3)  ;;  %v473_v20 = vld [vmem:[%s1245_s4 + $0x8] sm:$0xff] (!%p251_p3)  ;;  %vm714_vm4 = vcmask (!%p251_p3), 1043456   ;;  %vm753_vm5 = vcmask (!%p251_p3), 1045504  }
   0x9   : > { %350 = vperm.xlu0 (!%p251_p3), %987, %v340_v2   ;;  %v474_v22 = vld [vmem:[%s1245_s4 + $0x10] sm:$0xf] (!%p251_p3)  ;;  %v338_v23 = vld [vmem:[%s1243_s2 + $0x18] sm:$0x3f] (!%p251_p3)  ;;  %v615_v62 = vld [vmem:[%s1246_s5] sm:$0xff] (!%p251_p3) }
   0xa   : > { %v341_v24 = vld [vmem:[%s1244_s3 + $0x10] sm:$0xff] (!%p251_p3)  ;;  %v342_v25 = vld [vmem:[%s1244_s3 + $0x18] sm:$0x3f] (!%p251_p3)  ;;  %v616_v63 = vld [vmem:[%s1246_s5 + $0x8] sm:$0x3] (!%p251_p3) }
   0xb   : > { %355 = vperm.xlu1 (!%p251_p3), %988, %v341_v24  }
   0xd   : > { %345 = vperm.xlu0 (!%p251_p3), %987, %v339_v3  }
   0xe   : > { %s1255_s21 = smov (!%p298_p4, %s1035_s21), 1 }
   0xf   : > { %s1106_s27 = sshll.u32 %s1255_s21, 5  ;;  %360 = vperm.xlu1 %988, %v342_v25  }
  0x10   : > { %s305_s8 = scalar_lea.vmem %s1241_s0, %s1106_s27  ;;  %s315_s11 = scalar_lea.vmem %s1242_s1, %s1106_s27 }
  0x11   : > { %v328_v5 = vld [vmem:[%s305_s8 + $0x8] sm:$0xff]  ;;  %v330_v6 = vld [vmem:[%s305_s8 + $0x18] sm:$0x3]  ;;  %v1123_v7 = vld [vmem:[%s315_s11] sm:$0xff]  ;;  %s325_s16 = scalar_lea.vmem %s1247_s6, %s1106_s27 }
  0x12   : > { %v1125_v8 = vld [vmem:[%s315_s11 + $0x10] sm:$0x3]  ;;  %v932_v9 = vpack.c.bf16 %v330_v6, %v328_v5  ;;  %v327_v10 = vld [vmem:[%s305_s8] sm:$0xff]  ;;  %v1127_v13 = vld [vmem:[%s315_s11 + $0x8] sm:$0xff] }
  0x13   : > { %v329_v11 = vld [vmem:[%s305_s8 + $0x10] sm:$0x3]  ;;  %v1129_v14 = vld [vmem:[%s315_s11 + $0x18] sm:$0x3]  ;;  %v941_v17 = vpack.c.bf16 %v1125_v8, %v1123_v7 }
  0x14   : > { %v935_v12 = vpack.c.bf16 %v329_v11, %v327_v10  ;;  %934 = vmatprep.subr.msk.bf16.mxu0 %vm1119_vm2, %v932_v9  ;;  %950 = vmatprep.subr.msk.bf16.mxu1 %vm1119_vm2, %v932_v9  ;;  %v938_v15 = vpack.c.bf16 %v1129_v14, %v1127_v13 }
  0x16   : > { %937 = vmatpush1.bf16.msk.msra.mxu0 %vm1119_vm2, %v935_v12  ;;  %951 = vmatpush1.bf16.msk.msra.mxu1 %vm1119_vm2, %v935_v12 }
  0x17   : > { %940 = vmatprep.subr.msk.bf16.mxu0 %vm1119_vm2, %v938_v15 }
  0x19   : > { %908 = vmatmul.mubr.msk.f32.vlgmr.msra.gmra.mrb[0].mxu0 %vm363_vm3, %v335_v16  ;;  %909 = vmatmul.mubr.msk.f32.vlgmr.msra.gmra.mrb[0].mxu1 %vm363_vm3, %v336_v18 }
  0x1a   : > { %943 = vmatpush1.bf16.msk.msra.mxu0 %vm1119_vm2, %v941_v17  ;;  %554 = vmatprep.mubr.f32.mxu0 %v1045_v0 }
  0x1b   : > { %459 = vmatprep.mubr.f32.mxu1 %v1045_v0 }
  0x1d   : > { %910 = vmatmul.mubr.msk.f32.gmra.mrb[2].mxu1 %vm363_vm3, %v337_v21 }
  0x1e   : > { %465 = vmatprep.mubr.f32.mxu1 %v1045_v0 }
  0x21   : > { %914 = vmatmul.mubr.msk.f32.vlgmr.msra.gmra.mrb[0].mxu0 %vm363_vm3, %v472_v19  ;;  %911 = vmatmul.mubr.msk.f32.gmra.mrb[4].mxu1 %vm363_vm3, %v338_v23 }
  0x22   : > { %560 = vmatprep.mubr.f32.mxu0 %v1045_v0  ;;  %697 = vmatprep.mubr.f32.mxu1 %v1045_v0 }
  0x25   : > { %915 = vmatmul.mubr.msk.f32.gmra.mrb[2].mxu0 %vm363_vm3, %v473_v20 }
  0x26   : > { %566 = vmatprep.mubr.f32.mxu0 %v1045_v0 }
  0x29   : > { %916 = vmatmul.mubr.msk.f32.gmra.mrb[4].mxu0 %vm363_vm3, %v474_v22 }
  0x88   : > { %v351_v26 = vpop.permute.xlu0 %350 }
  0x8a   : > { %v356_v1 = vpop.permute.xlu1 %355 }
  0x8c   : > { %v346_v29 = vpop.permute.xlu0 %345 }
  0x8e   : > { %v361_v22 = vpop.permute.xlu1 %360 }
  0xec   : > { %v455_v27 = vpop.f32.mrb[0].mxu1 }
  0xed   : > { %v457_v28 = vpop.f32.mrb[1].mxu1  ;;  %v456_v31 = vadd.f32 %v455_v27, %v351_v26 }
  0xee   : > { %v458_v36 = vadd.f32 %v457_v28, %v351_v26 }
  0xf0   : > { %v461_v2 = vpop.f32.mrb[2].mxu1 }
  0xf1   : > { %v462_v5 = vadd.f32 %v461_v2, %v356_v1  ;;  %v463_v4 = vpop.f32.mrb[3].mxu1 }
  0xf2   : > { %v464_v9 = vadd.f32 %v463_v4, %v356_v1 }
  0xf4   : > { %v556_v30 = vpop.f32.mrb[0].mxu0  ;;  %v467_v12 = vpop.f32.mrb[4].mxu1 }
  0xf5   : > { %v952_v32 = vadd.f32 %v556_v30, %v346_v29  ;;  %v558_v33 = vpop.f32.mrb[1].mxu0  ;;  %v469_v15 = vpop.f32.mrb[5].mxu1  ;;  %v468_v27 = vadd.f32 %v467_v12, %v361_v22 }
  0xf6   : > { %v953_v34 = vadd.f32 %v558_v33, %v346_v29  ;;  %v470_v30 = vadd.f32 %v469_v15, %v361_v22 }
  0xf7   : > { %v917_v35 = vmul.f32 -1.442695, %v952_v32 }
  0xf8   : > { %v918_v37 = vmul.f32 -1.442695, %v953_v34  ;;  %v562_v38 = vpop.f32.mrb[2].mxu0 }
  0xf9   : > { %989 = vpow2.f32 %v917_v35  ;;  %v575_v39 = vadd.f32 %v562_v38, %v456_v31  ;;  %v564_v40 = vpop.f32.mrb[3].mxu0  ;;  %v737_v38 = vrot.slane %v1125_v8, 4 }
  0xfa   : > { %991 = vpow2.f32 %v918_v37  ;;  %v576_v41 = vadd.f32 %v564_v40, %v458_v36  ;;  %v735_v40 = vrot.slane %v1123_v7, 4 }
  0xfb   : > { %v919_v42 = vmul.f32 -1.442695, %v575_v39  ;;  %v739_v39 = vrot.slane %v1129_v14, 4 }
  0xfc   : > { %v920_v43 = vmul.f32 -1.442695, %v576_v41  ;;  %v568_v3 = vpop.f32.mrb[4].mxu0 }
  0xfd   : > { %993 = vpow2.f32 %v919_v42  ;;  %v570_v6 = vpop.f32.mrb[5].mxu0  ;;  %v577_v10 = vadd.f32 %v568_v3, %v462_v5  ;;  %v736_v42 = vrot.slane %v1127_v13, 4 }
  0xfe   : > { %995 = vpow2.f32 %v920_v43  ;;  %v578_v11 = vadd.f32 %v570_v6, %v464_v9 }
  0xff   : > { %v921_v16 = vmul.f32 -1.442695, %v577_v10 }
 0x100   : > { %v922_v17 = vmul.f32 -1.442695, %v578_v11 }
 0x103   : > { %v990_v44 = vpop.eup %989 }
 0x104   : > { %v992_v45 = vpop.eup %991  ;;  %v597_v46 = vadd.f32 1.0, %v990_v44  ;;  %v738_v44 = vsel %vm714_vm4, %v735_v40, %v737_v38 }
 0x105   : > { %v598_v47 = vadd.f32 1.0, %v992_v45 }
 0x106   : > { %997 = vrcp.f32 %v597_v46  ;;  %v740_v46 = vsel %vm714_vm4, %v736_v42, %v739_v39 }
 0x107   : > { %v994_v48 = vpop.eup %993  ;;  %999 = vrcp.f32 %v598_v47 }
 0x108   : > { %v996_v49 = vpop.eup %995  ;;  %v599_v50 = vadd.f32 1.0, %v994_v48 }
 0x109   : > { %v600_v51 = vadd.f32 1.0, %v996_v49 }
 0x10a   : > { %1001 = vrcp.f32 %v599_v50 }
 0x10b   : > { %1003 = vrcp.f32 %v600_v51 }
 0x10c   : > { %1005 = vpow2.f32 %v921_v16 }
 0x10d   : > { %1007 = vpow2.f32 %v922_v17 }
 0x110   : > { %v998_v52 = vpop.eup %997 }
 0x111   : > { %v1000_v53 = vpop.eup %999  ;;  %v617_v59 = vmul.f32 %v998_v52, %v1123_v7 }
 0x112   : > { %v618_v57 = vmul.f32 %v1000_v53, %v1127_v13 }
 0x114   : > { %v1187_v54 = vpop.eup %1001 }
 0x115   : > { %v1189_v55 = vpop.eup %1003  ;;  %v619_v56 = vmul.f32 %v1187_v54, %v1125_v8 }
 0x116   : > { %v620_v58 = vmul.f32 %v1189_v55, %v1129_v14  ;;  %v1006_v29 = vpop.eup %1005 }
 0x117   : > { %v947_v61 = vpack.c.bf16 %v619_v56, %v617_v59  ;;  %v1008_v32 = vpop.eup %1007  ;;  %v601_v36 = vadd.f32 1.0, %v1006_v29 }
 0x118   : > { %v944_v60 = vpack.c.bf16 %v620_v58, %v618_v57  ;;  %v602_v37 = vadd.f32 1.0, %v1008_v32 }
 0x11a   : > { %946 = vmatprep.subr.msk.bf16.mxu1 %vm1119_vm2, %v944_v60 }
 0x11b   : > { %949 = vmatpush1.bf16.msk.msra.mxu1 %vm1119_vm2, %v947_v61 }
 0x11e   : > { %925 = vmatmul.mubr.msk.f32.vlgmr.msra.gmra.mrb[6].mxu1 %vm363_vm3, %v615_v62 }
 0x11f   : > { %703 = vmatprep.mubr.f32.mxu1 %v1045_v0 }
 0x122   : > { %926 = vmatmul.mubr.msk.f32.gmra.mrb[8].mxu1 %vm363_vm3, %v616_v63 }
 0x1f1   : > { %v699_v0 = vpop.f32.mrb[6].mxu1 }
 0x1f2   : > { %v715_v18 = vrot.slane %v699_v0, 4  ;;  %v701_v19 = vpop.f32.mrb[7].mxu1 }
 0x1f3   : > { %v716_v20 = vrot.slane %v701_v19, 4 }
 0x1f4   : > { %v725_v21 = vadd.f32 %v715_v18, %v462_v5 }
 0x1f5   : > { %v726_v23 = vadd.f32 %v716_v20, %v464_v9  ;;  %v705_v24 = vpop.f32.mrb[8].mxu1 }
 0x1f6   : > { %v717_v25 = vrot.slane %v705_v24, 4  ;;  %v707_v26 = vpop.f32.mrb[9].mxu1  ;;  %1009 = vtanh.f32 %v725_v21 }
 0x1f7   : > { %v719_v28 = vrot.slane %v707_v26, 4  ;;  %1011 = vtanh.f32 %v726_v23 }
 0x1f8   : > { %v718_v31 = vsel %vm714_vm4, %v715_v18, %v717_v25 }
 0x1f9   : > { %v727_v33 = vadd.f32 %v718_v31, %v468_v27  ;;  %v720_v34 = vsel %vm714_vm4, %v716_v20, %v719_v28 }
 0x1fa   : > { %v728_v35 = vadd.f32 %v720_v34, %v470_v30 }
 0x1fb   : > { %1013 = vtanh.f32 %v727_v33 }
 0x1fc   : > { %1015 = vtanh.f32 %v728_v35 }
 0x1fd   : > { %1017 = vrcp.f32 %v601_v36 }
 0x1fe   : > { %1019 = vrcp.f32 %v602_v37 }
 0x200   : > { %v1010_v41 = vpop.eup %1009 }
 0x201   : > { %v1012_v43 = vpop.eup %1011  ;;  %v745_v45 = vsub.f32 %v1010_v41, %v735_v40 }
 0x202   : > { %v746_v48 = vsub.f32 %v1012_v43, %v736_v42 }
 0x203   : > { %v754_v52 = vrot.slane %v745_v45, 2 }
 0x204   : > { %v757_v57 = vrot.slane %v746_v48, 2 }
 0x205   : > { %v1014_v47 = vpop.eup %1013 }
 0x206   : > { %v1016_v49 = vpop.eup %1015  ;;  %v747_v50 = vsub.f32 %v1014_v47, %v738_v44 }
 0x207   : > { %v748_v51 = vsub.f32 %v1016_v49, %v740_v46  ;;  %v1018_v56 = vpop.eup %1017 }
 0x208   : > { %v755_v53 = vrot.slane %v747_v50, 2  ;;  %v1020_v59 = vpop.eup %1019 }
 0x209   : > { %v758_v58 = vrot.slane %v748_v51, 2 }
 0x20a   : > { %v756_v60 = vsel %vm753_vm5, %v754_v52, %v755_v53  ;;  %v766_v61 = vmul.f32 %v1018_v56, %v755_v53 }
 0x20b   : > { %v764_v62 = vmul.f32 %v1187_v54, %v756_v60  ;;  %v759_v63 = vsel %vm753_vm5, %v757_v57, %v758_v58  ;;  %v767_v1 = vmul.f32 %v1020_v59, %v758_v58 }
 0x20c   : > { %v773_v2 = vrot.slane %v766_v61, 2  ;;  %v765_v3 = vmul.f32 %v1189_v55, %v759_v63 }
 0x20d   : > { %v772_v5 = vrot.slane %v764_v62, 2  ;;  %v776_v4 = vrot.slane %v767_v1, 2 }
 0x20e   : > { %v784_v6 = vadd.f32 %v773_v2, %v1125_v8  ;;  %v775_v9 = vrot.slane %v765_v3, 2 }
 0x20f   : > { %v774_v10 = vsel %vm753_vm5, %v772_v5, %v773_v2  ;;  %v785_v11 = vadd.f32 %v776_v4, %v1129_v14 }
 0x210   : > { %v782_v54 = vadd.f32 %v774_v10, %v1123_v7  ;;  %788 = vst [vmem:[%s325_s16 + $0x10] sm:$0x3] %v784_v6  ;;  %v777_v12 = vsel %vm753_vm5, %v775_v9, %v776_v4 }
 0x211   : > { %v783_v55 = vadd.f32 %v777_v12, %v1127_v13  ;;  %789 = vst [vmem:[%s325_s16 + $0x18] sm:$0x3] %v785_v11 }
 0x212   : > { %786 = vst [vmem:[%s325_s16] sm:$0xff] %v782_v54 }
 0x213   : > { %787 = vst [vmem:[%s325_s16 + $0x8] sm:$0xff] %v783_v55 }
 0x214 PF: > { %s16_s23 = sadd.s32 1, %s1043_s23   ;;  %s1250_s21 = smov %s1039_s22 }
 0x215   : > { %p13_p5 = scmp.ge.s32.totalorder %s16_s23, 4   ;;  %s1251_s22 = smov %s1253_s24 }
 0x217   :  { %15 = sbr.rel (!%p13_p5) target bundleno = 2 (0x2), region = 77 }

</bundles_post_ra>
